<compile_context>
chip_gen: v7x
topology: tpu7x:2x2x1
jax: 0.10.0
libtpu: 0.0.40
codegen_flags: <defaults>
</compile_context>

<pallas_src>
import jax
import jax.numpy as jnp
from jax.experimental import pallas as pl
from jax.experimental.pallas import tpu as pltpu


def _round_up(x, m):
    return ((x + m - 1) // m) * m


def dueling_dqn_kernel(
    x_ref,
    w1_ref, b1_ref,
    w2_ref, b2_ref,
    wbr_ref, bbr_ref,
    whd_ref, bhd_ref,
    out_ref,
):
    # In-kernel f32 -> bf16 cast of x (avoids a wrapper-side extra pass over x).
    x = x_ref[...].astype(w1_ref.dtype)          # bf16 [TB, in_dim]

    # fc1 + relu  (bf16 MXU operands, f32 accumulate + f32 elementwise)
    h = jnp.dot(x, w1_ref[...], preferred_element_type=jnp.float32) + b1_ref[...]
    h = jnp.maximum(h, 0.0)

    # fc2 + relu
    h = jnp.dot(h.astype(w2_ref.dtype), w2_ref[...],
                preferred_element_type=jnp.float32) + b2_ref[...]
    h = jnp.maximum(h, 0.0)

    # dropout(p=0.2): identity (eval mode)

    # fused value_fc | advantage_fc -> [TB, 128] (value feats lanes 0-63, adv 64-127)
    br = jnp.dot(h.astype(wbr_ref.dtype), wbr_ref[...],
                 preferred_element_type=jnp.float32) + bbr_ref[...]
    br = jnp.maximum(br, 0.0)

    # fused heads + dueling combine (mean-subtraction pre-folded into weights):
    # q[:, j] = v @ wv2 + bv2 + a @ (wa2 @ (I - 1/A))[:, j] + (ba2 @ (I - 1/A))[j]
    q = jnp.dot(br.astype(whd_ref.dtype), whd_ref[...],
                preferred_element_type=jnp.float32) + bhd_ref[...]

    # Narrow writeback: only the real action_dim columns go back to HBM.
    a_dim = out_ref.shape[-1]
    out_ref[...] = q[:, :a_dim].astype(out_ref.dtype)


def _fuse_params(params, action_dim, out_pad):
    """Host-side weight prep: branch fusion + head fusion + mean folding."""
    A = action_dim
    # Fused branch layer [128, 128]: columns 0-63 = value_fc, 64-127 = advantage_fc.
    w_branch = jnp.concatenate([params["wv1"], params["wa1"]], axis=1)
    b_branch = jnp.concatenate([params["bv1"], params["ba1"]], axis=1)

    # Fold the dueling mean-subtraction into the advantage head:
    # adv - mean(adv) == a @ (wa2 @ C) + ba2 @ C, with C = I - ones/A.
    C = jnp.eye(A, dtype=jnp.float32) - jnp.full((A, A), 1.0 / A, jnp.float32)
    wa2c = params["wa2"] @ C                     # [64, A]
    ba2c = params["ba2"] @ C                     # [1, A]

    # Block-structured fused head [128, out_pad]:
    #   rows 0..63   -> value weight broadcast across the A real columns
    #   rows 64..127 -> centered advantage weights
    # padded columns (>= A) are zero.
    w_head = jnp.zeros((128, out_pad), jnp.float32)
    w_head = w_head.at[:64, :A].set(jnp.broadcast_to(params["wv2"], (64, A)))
    w_head = w_head.at[64:, :A].set(wa2c)
    b_head = jnp.zeros((1, out_pad), jnp.float32)
    b_head = b_head.at[:, :A].set(params["bv2"] + ba2c)

    bf16 = jnp.bfloat16
    return dict(
        w1=params["w1"].astype(bf16), b1=params["b1"],
        w2=params["w2"].astype(bf16), b2=params["b2"],
        wbr=w_branch.astype(bf16), bbr=b_branch,
        whd=w_head.astype(bf16), bhd=b_head,
    )


def dueling_dqn_forward(x, params, *, tb=2048):
    """x: [B, input_dim] float32. params: dict from init_params (pre-transposed)."""
    B, in_dim = x.shape
    action_dim = params["wa2"].shape[1]
    out_pad = _round_up(max(action_dim, 128), 128)   # MXU-friendly padded head width

    fused = _fuse_params(params, action_dim, out_pad)

    # Batch tile selection:
    #   * tiny batches -> single tile (rounded up to a sublane multiple)
    #   * otherwise   -> at least 2 grid steps (v7x dual-TC sharding), capped at tb
    #     so large batches use big tiles that amortize per-step overhead.
    if B <= 16:
        TB = _round_up(B, 8)
    else:
        TB = min(tb, _round_up(pl.cdiv(B, 2), 8))
    B_pad = _round_up(B, TB)
    grid_b = B_pad // TB

    # x stays f32 (cast happens in-kernel); pad only the remainder when needed.
    x_p = x if B_pad == B else jnp.pad(x, ((0, B_pad - B), (0, 0)))

    resident = lambda shape: pl.BlockSpec(shape, lambda i: (0, 0))
    args = (
        x_p,
        fused["w1"], fused["b1"],
        fused["w2"], fused["b2"],
        fused["wbr"], fused["bbr"],
        fused["whd"], fused["bhd"],
    )
    in_specs = [
        pl.BlockSpec((TB, in_dim), lambda i: (i, 0)),     # x: tiled over batch
        resident(fused["w1"].shape), resident(fused["b1"].shape),
        resident(fused["w2"].shape), resident(fused["b2"].shape),
        resident(fused["wbr"].shape), resident(fused["bbr"].shape),
        resident(fused["whd"].shape), resident(fused["bhd"].shape),
    ]
    out_spec = pl.BlockSpec((TB, action_dim), lambda i: (i, 0))

    weight_bytes = sum(int(v.size) * v.dtype.itemsize for v in fused.values())
    cost = pl.CostEstimate(
        flops=2 * B_pad * (in_dim * 128 + 128 * 128 + 128 * 128 + 128 * out_pad),
        transcendentals=0,
        bytes_accessed=B_pad * in_dim * 4 + B_pad * action_dim * 4 + weight_bytes,
    )

    out = pl.pallas_call(
        dueling_dqn_kernel,
        out_shape=jax.ShapeDtypeStruct((B_pad, action_dim), jnp.float32),
        grid=(grid_b,),
        in_specs=in_specs,
        out_specs=out_spec,
        compiler_params=pltpu.CompilerParams(
            dimension_semantics=("parallel",),
            vmem_limit_bytes=32 * 1024 * 1024,
        ),
        cost_estimate=cost,
    )(*args)

    return out[:B] if B_pad != B else out


def init_params(key, input_dim, action_dim):
    """Deterministic init. Weights stored as [in, out] (pre-transposed), biases as [1, out]."""
    def linear(k, fan_in, fan_out):
        kw, kb = jax.random.split(k)
        bound = 1.0 / jnp.sqrt(fan_in)
        w = jax.random.uniform(kw, (fan_in, fan_out), jnp.float32, -bound, bound)
        b = jax.random.uniform(kb, (1, fan_out), jnp.float32, -bound, bound)
        return w, b

    keys = jax.random.split(key, 6)
    w1, b1 = linear(keys[0], input_dim, 128)
    w2, b2 = linear(keys[1], 128, 128)
    wv1, bv1 = linear(keys[2], 128, 64)
    wv2, bv2 = linear(keys[3], 64, 1)
    wa1, ba1 = linear(keys[4], 128, 64)
    wa2, ba2 = linear(keys[5], 64, action_dim)
    return dict(
        w1=w1, b1=b1, w2=w2, b2=b2,
        wv1=wv1, bv1=bv1, wv2=wv2, bv2=bv2,
        wa1=wa1, ba1=ba1, wa2=wa2, ba2=ba2,
    )


def dueling_dqn_ref(x, p):
    """Pure-JAX f32 reference matching the PyTorch forward (eval mode)."""
    h = jax.nn.relu(x @ p["w1"] + p["b1"])
    h = jax.nn.relu(h @ p["w2"] + p["b2"])
    value = jax.nn.relu(h @ p["wv1"] + p["bv1"]) @ p["wv2"] + p["bv2"]
    adv = jax.nn.relu(h @ p["wa1"] + p["ba1"]) @ p["wa2"] + p["ba2"]
    return value + (adv - adv.mean(axis=1, keepdims=True))


if __name__ == "__main__":
    key = jax.random.PRNGKey(0)
    k_x, k_p = jax.random.split(key)

    batch = 256
    input_dim = 32
    action_dim = 4

    x = jax.random.normal(k_x, (batch, input_dim), jnp.float32)
    params = init_params(k_p, input_dim, action_dim)

    # default tb=2048 -> TB=128 here, grid=(2,): exercises the pipelined/parallel path
    out = dueling_dqn_forward(x, params)
    out = jax.block_until_ready(out)

    ref = dueling_dqn_ref(x, params)
    assert out.shape == (batch, action_dim), out.shape
    # bf16 MXU operands with f32 accumulation -> loose-ish tolerance vs f32 ref.
    max_err = float(jnp.max(jnp.abs(out - ref)))
    assert jnp.allclose(out, ref, atol=5e-2, rtol=5e-2), max_err

    print("KERNEL_OK")
</pallas_src>

<mosaic_0001>
module attributes {stable_mosaic.version = 11 : i64} {
  func.func @dueling_dqn_kernel(%arg0: i32, %arg1: memref<128x32xf32, #tpu.memory_space<vmem>>, %arg2: memref<32x128xbf16, #tpu.memory_space<vmem>>, %arg3: memref<1x128xf32, #tpu.memory_space<vmem>>, %arg4: memref<128x128xbf16, #tpu.memory_space<vmem>>, %arg5: memref<1x128xf32, #tpu.memory_space<vmem>>, %arg6: memref<128x128xbf16, #tpu.memory_space<vmem>>, %arg7: memref<1x128xf32, #tpu.memory_space<vmem>>, %arg8: memref<128x128xbf16, #tpu.memory_space<vmem>>, %arg9: memref<1x128xf32, #tpu.memory_space<vmem>>, %arg10: memref<128x4xf32, #tpu.memory_space<vmem>>) attributes {dimension_semantics = [#tpu.dimension_semantics<parallel>], iteration_bounds = array<i64: 2>, scalar_prefetch = 0 : i64, scratch_operands = 0 : i64, tpu.core_type = #tpu.core_type<tc>, window_params = [{transform_indices = @transform_0, window_bounds = array<i64: 128, 32>}, {pipeline_mode = #tpu.pipeline_mode<synchronous>, transform_indices = @transform_1, window_bounds = array<i64: 32, 128>}, {pipeline_mode = #tpu.pipeline_mode<synchronous>, transform_indices = @transform_2, window_bounds = array<i64: 1, 128>}, {pipeline_mode = #tpu.pipeline_mode<synchronous>, transform_indices = @transform_3, window_bounds = array<i64: 128, 128>}, {pipeline_mode = #tpu.pipeline_mode<synchronous>, transform_indices = @transform_4, window_bounds = array<i64: 1, 128>}, {pipeline_mode = #tpu.pipeline_mode<synchronous>, transform_indices = @transform_5, window_bounds = array<i64: 128, 128>}, {pipeline_mode = #tpu.pipeline_mode<synchronous>, transform_indices = @transform_6, window_bounds = array<i64: 1, 128>}, {pipeline_mode = #tpu.pipeline_mode<synchronous>, transform_indices = @transform_7, window_bounds = array<i64: 128, 128>}, {pipeline_mode = #tpu.pipeline_mode<synchronous>, transform_indices = @transform_8, window_bounds = array<i64: 1, 128>}, {transform_indices = @transform_9, window_bounds = array<i64: 128, 4>}]} {
    %c0 = arith.constant 0 : index
    %c0_0 = arith.constant 0 : index
    %0 = vector.load %arg1[%c0, %c0_0] : memref<128x32xf32, #tpu.memory_space<vmem>>, vector<128x32xf32>
    %1 = arith.truncf %0 : vector<128x32xf32> to vector<128x32xbf16>
    %c0_1 = arith.constant 0 : index
    %c0_2 = arith.constant 0 : index
    %2 = vector.load %arg2[%c0_1, %c0_2] : memref<32x128xbf16, #tpu.memory_space<vmem>>, vector<32x128xbf16>
    %cst = arith.constant dense<0.000000e+00> : vector<128x128xf32>
    %3 = tpu.matmul %1, %2, %cst {dimension_numbers = #tpu.dot_dimension_numbers<[1], [0], [0], [1], [0, 0, 1, 1], [], []>} : vector<128x32xbf16>, vector<32x128xbf16>, vector<128x128xf32> -> vector<128x128xf32>
    %c0_3 = arith.constant 0 : index
    %c0_4 = arith.constant 0 : index
    %4 = vector.load %arg3[%c0_3, %c0_4] : memref<1x128xf32, #tpu.memory_space<vmem>>, vector<1x128xf32>
    %5 = vector.broadcast %4 : vector<1x128xf32> to vector<128x128xf32>
    %6 = arith.addf %3, %5 : vector<128x128xf32>
    %cst_5 = arith.constant 0.000000e+00 : f32
    %7 = vector.broadcast %cst_5 : f32 to vector<128x128xf32>
    %8 = arith.maximumf %6, %7 : vector<128x128xf32>
    %9 = arith.truncf %8 : vector<128x128xf32> to vector<128x128xbf16>
    %c0_6 = arith.constant 0 : index
    %c0_7 = arith.constant 0 : index
    %10 = vector.load %arg4[%c0_6, %c0_7] : memref<128x128xbf16, #tpu.memory_space<vmem>>, vector<128x128xbf16>
    %cst_8 = arith.constant dense<0.000000e+00> : vector<128x128xf32>
    %11 = tpu.matmul %9, %10, %cst_8 {dimension_numbers = #tpu.dot_dimension_numbers<[1], [0], [0], [1], [0, 0, 1, 1], [], []>} : vector<128x128xbf16>, vector<128x128xbf16>, vector<128x128xf32> -> vector<128x128xf32>
    %c0_9 = arith.constant 0 : index
    %c0_10 = arith.constant 0 : index
    %12 = vector.load %arg5[%c0_9, %c0_10] : memref<1x128xf32, #tpu.memory_space<vmem>>, vector<1x128xf32>
    %13 = vector.broadcast %12 : vector<1x128xf32> to vector<128x128xf32>
    %14 = arith.addf %11, %13 : vector<128x128xf32>
    %cst_11 = arith.constant 0.000000e+00 : f32
    %15 = vector.broadcast %cst_11 : f32 to vector<128x128xf32>
    %16 = arith.maximumf %14, %15 : vector<128x128xf32>
    %17 = arith.truncf %16 : vector<128x128xf32> to vector<128x128xbf16>
    %c0_12 = arith.constant 0 : index
    %c0_13 = arith.constant 0 : index
    %18 = vector.load %arg6[%c0_12, %c0_13] : memref<128x128xbf16, #tpu.memory_space<vmem>>, vector<128x128xbf16>
    %cst_14 = arith.constant dense<0.000000e+00> : vector<128x128xf32>
    %19 = tpu.matmul %17, %18, %cst_14 {dimension_numbers = #tpu.dot_dimension_numbers<[1], [0], [0], [1], [0, 0, 1, 1], [], []>} : vector<128x128xbf16>, vector<128x128xbf16>, vector<128x128xf32> -> vector<128x128xf32>
    %c0_15 = arith.constant 0 : index
    %c0_16 = arith.constant 0 : index
    %20 = vector.load %arg7[%c0_15, %c0_16] : memref<1x128xf32, #tpu.memory_space<vmem>>, vector<1x128xf32>
    %21 = vector.broadcast %20 : vector<1x128xf32> to vector<128x128xf32>
    %22 = arith.addf %19, %21 : vector<128x128xf32>
    %cst_17 = arith.constant 0.000000e+00 : f32
    %23 = vector.broadcast %cst_17 : f32 to vector<128x128xf32>
    %24 = arith.maximumf %22, %23 : vector<128x128xf32>
    %25 = arith.truncf %24 : vector<128x128xf32> to vector<128x128xbf16>
    %c0_18 = arith.constant 0 : index
    %c0_19 = arith.constant 0 : index
    %26 = vector.load %arg8[%c0_18, %c0_19] : memref<128x128xbf16, #tpu.memory_space<vmem>>, vector<128x128xbf16>
    %cst_20 = arith.constant dense<0.000000e+00> : vector<128x128xf32>
    %27 = tpu.matmul %25, %26, %cst_20 {dimension_numbers = #tpu.dot_dimension_numbers<[1], [0], [0], [1], [0, 0, 1, 1], [], []>} : vector<128x128xbf16>, vector<128x128xbf16>, vector<128x128xf32> -> vector<128x128xf32>
    %c0_21 = arith.constant 0 : index
    %c0_22 = arith.constant 0 : index
    %28 = vector.load %arg9[%c0_21, %c0_22] : memref<1x128xf32, #tpu.memory_space<vmem>>, vector<1x128xf32>
    %29 = vector.broadcast %28 : vector<1x128xf32> to vector<128x128xf32>
    %30 = arith.addf %27, %29 : vector<128x128xf32>
    %31 = vector.extract_strided_slice %30 {offsets = [0, 0], sizes = [128, 4], strides = [1, 1]} : vector<128x128xf32> to vector<128x4xf32>
    %c0_23 = arith.constant 0 : index
    %c0_24 = arith.constant 0 : index
    %32 = vector.load %arg10[%c0_23, %c0_24] : memref<128x4xf32, #tpu.memory_space<vmem>>, vector<128x4xf32>
    tpu.vector_store %arg10[%c0_23, %c0_24], %31 {strides = array<i32>} : memref<128x4xf32, #tpu.memory_space<vmem>>, vector<128x4xf32>,
    return
  }
  func.func @transform_0(%arg0: i32) -> (i32, i32) {
    %c0_i32 = arith.constant 0 : i32
    %c0_i32_0 = arith.constant 0 : i32
    return %arg0, %c0_i32 : i32, i32
  }
  func.func @transform_1(%arg0: i32) -> (i32, i32) {
    %c0_i32 = arith.constant 0 : i32
    %c0_i32_0 = arith.constant 0 : i32
    %c0_i32_1 = arith.constant 0 : i32
    return %c0_i32, %c0_i32_0 : i32, i32
  }
  func.func @transform_2(%arg0: i32) -> (i32, i32) {
    %c0_i32 = arith.constant 0 : i32
    %c0_i32_0 = arith.constant 0 : i32
    %c0_i32_1 = arith.constant 0 : i32
    return %c0_i32, %c0_i32_0 : i32, i32
  }
  func.func @transform_3(%arg0: i32) -> (i32, i32) {
    %c0_i32 = arith.constant 0 : i32
    %c0_i32_0 = arith.constant 0 : i32
    %c0_i32_1 = arith.constant 0 : i32
    return %c0_i32, %c0_i32_0 : i32, i32
  }
  func.func @transform_4(%arg0: i32) -> (i32, i32) {
    %c0_i32 = arith.constant 0 : i32
    %c0_i32_0 = arith.constant 0 : i32
    %c0_i32_1 = arith.constant 0 : i32
    return %c0_i32, %c0_i32_0 : i32, i32
  }
  func.func @transform_5(%arg0: i32) -> (i32, i32) {
    %c0_i32 = arith.constant 0 : i32
    %c0_i32_0 = arith.constant 0 : i32
    %c0_i32_1 = arith.constant 0 : i32
    return %c0_i32, %c0_i32_0 : i32, i32
  }
  func.func @transform_6(%arg0: i32) -> (i32, i32) {
    %c0_i32 = arith.constant 0 : i32
    %c0_i32_0 = arith.constant 0 : i32
    %c0_i32_1 = arith.constant 0 : i32
    return %c0_i32, %c0_i32_0 : i32, i32
  }
  func.func @transform_7(%arg0: i32) -> (i32, i32) {
    %c0_i32 = arith.constant 0 : i32
    %c0_i32_0 = arith.constant 0 : i32
    %c0_i32_1 = arith.constant 0 : i32
    return %c0_i32, %c0_i32_0 : i32, i32
  }
  func.func @transform_8(%arg0: i32) -> (i32, i32) {
    %c0_i32 = arith.constant 0 : i32
    %c0_i32_0 = arith.constant 0 : i32
    %c0_i32_1 = arith.constant 0 : i32
    return %c0_i32, %c0_i32_0 : i32, i32
  }
  func.func @transform_9(%arg0: i32) -> (i32, i32) {
    %c0_i32 = arith.constant 0 : i32
    %c0_i32_0 = arith.constant 0 : i32
    return %arg0, %c0_i32 : i32, i32
  }
}

</mosaic_0001>

<bundles_post_ra>
// kernel: tpu_custom_call.1
= control target key start
LH: loop header
LB: loop body
LE: loop exit
PB: predicated region body
PF: predicated region fallthrough
CT: control target
= control target key end

     0   :  { %s1486_s30 = smov 0   ;;  %s1696_s0 = inlined_call_operand.vmem [shape: f32[256,32], index: 0, kind: input, shape index: {}]   ;;  %s1697_s1 = inlined_call_operand.vmem [shape: bf16[32,128], index: 1, kind: input, shape index: {}]   ;;  %s1698_s2 = inlined_call_operand.vmem [shape: f32[1,128], index: 2, kind: input, shape index: {}]   ;;  %s1699_s3 = inlined_call_operand.vmem [shape: bf16[128,128], index: 3, kind: input, shape index: {}]   ;;  %s1700_s4 = inlined_call_operand.vmem [shape: f32[1,128], index: 4, kind: input, shape index: {}]   ;;  %s1701_s5 = inlined_call_operand.vmem [shape: bf16[128,128], index: 5, kind: input, shape index: {}]   ;;  %s1702_s6 = inlined_call_operand.vmem [shape: f32[1,128], index: 6, kind: input, shape index: {}]   ;;  %s1703_s7 = inlined_call_operand.vmem [shape: bf16[128,128], index: 7, kind: input, shape index: {}]   ;;  %s1704_s8 = inlined_call_operand.vmem [shape: f32[1,128], index: 8, kind: input, shape index: {}]   ;;  %s1705_s9 = inlined_call_operand.vmem [shape: f32[256,4], index: 9, kind: output, shape index: {}]  }
   0x1 LB: > { %s1155_s10 = sadd.s32 4294967295, %s1434_s30   ;;  %p1159_p0 = scmp.ge.s32.totalorder %s1434_s30, 1  ;;  %s1434_s30 = sphi %s1486_s30, %s19_s30  }
   0x2   : > { %p288_p1 = scmp.lt.s32.totalorder %s1434_s30, 3 }
   0x4   : > { %p289_p2 = pnand %p1159_p0, %p288_p1 }
   0x5   : > { %v1402_v0 = vld [vmem:[%s1697_s1] sm:$0xff] (!%p289_p2)   ;;  %s1160_s13 = sshll.u32 (!%p289_p2), %s1155_s10, 4  ;;  %v1403_v1 = vld [vmem:[%s1697_s1 + $0x8] sm:$0xff] (!%p289_p2)   ;;  %v1406_v4 = vld [vmem:[%s1699_s3 + $0x10] sm:$0xff] (!%p289_p2)   ;;  %vm384_vm0 = vcmask (!%p289_p2), 261120   ;;  %vm1082_vm1 = vcmask (!%p289_p2), 31744  }
   0x6   : > { %292 = sbr.rel (%p289_p2) target bundleno = 928 (0x3a0), region = 56  ;;  %p325_p3 = scmp.lt.s32.totalorder (!%p289_p2), %s1160_s13, 31  ;;  %1262 = vmatprep.subr.bf16.mxu0 (!%p289_p2), %v1402_v0  ;;  %v1404_v2 = vld [vmem:[%s1699_s3] sm:$0xff] (!%p289_p2)   ;;  %v1405_v3 = vld [vmem:[%s1699_s3 + $0x8] sm:$0xff] (!%p289_p2)   ;;  %v1407_v14 = vld [vmem:[%s1699_s3 + $0x18] sm:$0xff] (!%p289_p2)  }
   0x7   : > { %1263 = vmatpush3.bf16.msra.mxu0 (!%p289_p2), %v1402_v0  ;;  %1282 = vmatprep.subr.bf16.mxu1 (!%p289_p2), %v1404_v2  ;;  %v1408_v18 = vld [vmem:[%s1699_s3 + $0x20] sm:$0xff] (!%p289_p2)   ;;  %v1409_v22 = vld [vmem:[%s1699_s3 + $0x28] sm:$0xff] (!%p289_p2)   ;;  %v1410_v32 = vld [vmem:[%s1699_s3 + $0x30] sm:$0xff] (!%p289_p2)  }
   0x8   : > { %1264 = vmatprep.subr.bf16.mxu0 (!%p289_p2), %v1403_v1  ;;  %1283 = vmatpush3.bf16.msra.mxu1 (!%p289_p2), %v1404_v2  ;;  %v1411_v33 = vld [vmem:[%s1699_s3 + $0x38] sm:$0xff] (!%p289_p2)   ;;  %v1412_v34 = vld [vmem:[%s1701_s5] sm:$0xff] (!%p289_p2)   ;;  %v1413_v35 = vld [vmem:[%s1701_s5 + $0x8] sm:$0xff] (!%p289_p2)  }
   0x9   : > { %1284 = vmatprep.subr.bf16.mxu1 (!%p289_p2), %v1405_v3  ;;  %v1414_v36 = vld [vmem:[%s1701_s5 + $0x10] sm:$0xff] (!%p289_p2)   ;;  %v1415_v37 = vld [vmem:[%s1701_s5 + $0x18] sm:$0xff] (!%p289_p2)   ;;  %v1416_v38 = vld [vmem:[%s1701_s5 + $0x20] sm:$0xff] (!%p289_p2)  }
   0xa   : > { %v1417_v39 = vld [vmem:[%s1701_s5 + $0x28] sm:$0xff] (!%p289_p2)   ;;  %v1164_v40 = vld [vmem:[%s1698_s2] ss:$0 sm:$0xff] (!%p289_p2) }
   0xb   : > { %1265 = vmatpush3.bf16.msra.mxu0 (!%p289_p2), %v1403_v1 }
   0xc   : > { %1285 = vmatpush3.bf16.msra.mxu1 (!%p289_p2), %v1405_v3  ;;  %1314 = vmatprep.subr.bf16.mxu0 (!%p289_p2), %v1412_v34 }
   0xd   : > { %s1707_s13 = smov (!%p325_p3, %s1160_s13), 31  ;;  %1286 = vmatprep.subr.bf16.mxu1 %v1406_v4 }
   0xe   : > { %s1161_s20 = sshll.u32 %s1707_s13, 3 }
   0xf   : > { %s1514_s23 = scalar_lea.vmem %s1696_s0, %s1161_s20  ;;  %s1659_s24 = scalar_lea.vmem %s1705_s9, %s1161_s20 }
  0x10   : > { %v337_v5 = vld [vmem:[%s1514_s23] sm:$0xff]  ;;  %v338_v6 = vld [vmem:[%s1514_s23 + $0x8] sm:$0xff]  ;;  %v339_v7 = vld [vmem:[%s1514_s23 + $0x10] sm:$0xff]  ;;  %1287 = vmatpush3.bf16.msra.mxu1 %v1406_v4 }
  0x11   : > { %v353_v8 = vpack.c.bf16 %v338_v6, %v337_v5  ;;  %v340_v9 = vld [vmem:[%s1514_s23 + $0x18] sm:$0xff]  ;;  %v341_v10 = vld [vmem:[%s1514_s23 + $0x20] sm:$0xff]  ;;  %v342_v11 = vld [vmem:[%s1514_s23 + $0x28] sm:$0xff]  ;;  %1288 = vmatprep.subr.bf16.mxu1 %v1407_v14 }
  0x12   : > { %v354_v12 = vpack.c.bf16 %v340_v9, %v339_v7  ;;  %v355_v13 = vpack.c.bf16 %v342_v11, %v341_v10  ;;  %v343_v15 = vld [vmem:[%s1514_s23 + $0x30] sm:$0xff]  ;;  %v344_v16 = vld [vmem:[%s1514_s23 + $0x38] sm:$0xff]  ;;  %v345_v17 = vld [vmem:[%s1514_s23 + $0x40] sm:$0xff] }
  0x13   : > { %1266 = vmatprep.mubr.msk.bf16.mxu0 %vm384_vm0, %v353_v8  ;;  %v346_v19 = vld [vmem:[%s1514_s23 + $0x48] sm:$0xff]  ;;  %v356_v20 = vpack.c.bf16 %v344_v16, %v343_v15  ;;  %v347_v23 = vld [vmem:[%s1514_s23 + $0x50] sm:$0xff]  ;;  %v348_v24 = vld [vmem:[%s1514_s23 + $0x58] sm:$0xff] }
  0x14   : > { %1267 = vmatmul.mubr.msk.bf16.vlgmr.msra.gmra.mrb[0].mxu0 %vm384_vm0, %v354_v12  ;;  %v357_v21 = vpack.c.bf16 %v346_v19, %v345_v17  ;;  %1289 = vmatpush3.bf16.msra.mxu1 %v1407_v14  ;;  %v349_v25 = vld [vmem:[%s1514_s23 + $0x60] sm:$0xff]  ;;  %v350_v26 = vld [vmem:[%s1514_s23 + $0x68] sm:$0xff]  ;;  %v358_v27 = vpack.c.bf16 %v348_v24, %v347_v23  ;;  %v351_v29 = vld [vmem:[%s1514_s23 + $0x70] sm:$0xff] }
  0x15   : > { %1270 = vmatprep.mubr.msk.bf16.mxu0 %vm384_vm0, %v355_v13  ;;  %1290 = vmatprep.subr.bf16.mxu1 %v1408_v18  ;;  %v359_v28 = vpack.c.bf16 %v350_v26, %v349_v25  ;;  %v352_v30 = vld [vmem:[%s1514_s23 + $0x78] sm:$0xff] }
  0x16   : > { %v360_v31 = vpack.c.bf16 %v352_v30, %v351_v29  ;;  %1315 = vmatpush3.bf16.msra.mxu0 %v1412_v34  ;;  %v1419_v34 = vld [vmem:[%s1701_s5 + $0x38] sm:$0xff]  }
  0x17   : > { %1316 = vmatprep.subr.bf16.mxu0 %v1413_v35 }
  0x18   : > { %1291 = vmatpush3.bf16.msra.mxu1 %v1408_v18 }
  0x19   : > { %1292 = vmatprep.subr.bf16.mxu1 %v1409_v22 }
  0x1a   : > { %1317 = vmatpush3.bf16.msra.mxu0 %v1413_v35  ;;  %v1420_v35 = vld [vmem:[%s1703_s7] sm:$0xff]  }
  0x1b   : > { %1318 = vmatprep.subr.bf16.mxu0 %v1414_v36 }
  0x1c   : > { %1271 = vmatmul.mubr.msk.bf16.gmra.mrb[4].mxu0 %vm384_vm0, %v356_v20  ;;  %1293 = vmatpush3.bf16.msra.mxu1 %v1409_v22 }
  0x1d   : > { %1274 = vmatprep.mubr.msk.bf16.mxu0 %vm384_vm0, %v357_v21  ;;  %1294 = vmatprep.subr.bf16.mxu1 %v1410_v32 }
  0x1e   : > { %1319 = vmatpush3.bf16.msra.mxu0 %v1414_v36  ;;  %v1421_v36 = vld [vmem:[%s1703_s7 + $0x8] sm:$0xff]  }
  0x1f   : > { %1320 = vmatprep.subr.bf16.mxu0 %v1415_v37 }
  0x20   : > { %1295 = vmatpush3.bf16.msra.mxu1 %v1410_v32 }
  0x21   : > { %1296 = vmatprep.subr.bf16.mxu1 %v1411_v33 }
  0x22   : > { %1321 = vmatpush3.bf16.msra.mxu0 %v1415_v37  ;;  %v1422_v37 = vld [vmem:[%s1703_s7 + $0x10] sm:$0xff]  }
  0x23   : > { %1322 = vmatprep.subr.bf16.mxu0 %v1416_v38 }
  0x24   : > { %1275 = vmatmul.mubr.msk.bf16.gmra.mrb[8].mxu0 %vm384_vm0, %v358_v27  ;;  %1297 = vmatpush3.bf16.msra.mxu1 %v1411_v33  ;;  %v1418_v33 = vld [vmem:[%s1701_s5 + $0x30] sm:$0xff]  }
  0x25   : > { %1278 = vmatprep.mubr.msk.bf16.mxu0 %vm384_vm0, %v359_v28  ;;  %1378 = vmatprep.subr.bf16.mxu1 %v1420_v35 }
  0x26   : > { %1323 = vmatpush3.bf16.msra.mxu0 %v1416_v38  ;;  %v1597_v38 = vld [vmem:[%s1703_s7 + $0x18] sm:$0xff]  }
  0x27   : > { %1324 = vmatprep.subr.bf16.mxu0 %v1417_v39 }
  0x2a   : > { %1325 = vmatpush3.bf16.msra.mxu0 %v1417_v39  ;;  %v1603_v39 = vld [vmem:[%s1703_s7 + $0x20] sm:$0xff]  }
  0x2b   : > { %1326 = vmatprep.subr.bf16.mxu0 %v1418_v33 }
  0x2c   : > { %1279 = vmatmul.mubr.msk.bf16.gmra.mrb[12].mxu0 %vm384_vm0, %v360_v31 }
  0x2e   : > { %1327 = vmatpush3.bf16.msra.mxu0 %v1418_v33 }
  0x2f   : > { %1328 = vmatprep.subr.bf16.mxu0 %v1419_v34 }
  0x32   : > { %1329 = vmatpush3.bf16.msra.mxu0 %v1419_v34  ;;  %v1426_v34 = vld [vmem:[%s1703_s7 + $0x30] sm:$0xff]  }
  0x33   : > { %1346 = vmatprep.subr.bf16.mxu0 %v1420_v35 }
  0xe7   : > { %v1268_v41 = vpop.f32.mrb[0].mxu0 }
  0xe8   : > { %v452_v42 = vadd.f32 %v1268_v41, %v1164_v40  ;;  %v443_v43 = vpop.f32.mrb[1].mxu0  ;;  %v1618_v41 = vld [vmem:[%s1700_s4] ss:$0 sm:$0xff] }
  0xe9   : > { %v444_v44 = vadd.f32 %v1164_v40, %v443_v43  ;;  %v1269_v45 = vpop.f32.mrb[2].mxu0 }
  0xea   : > { %v455_v46 = vadd.f32 %v1269_v45, %v1164_v40  ;;  %v446_v47 = vpop.f32.mrb[3].mxu0  ;;  %v508_v49 = vmax.f32 %v452_v42, 0.0 }
  0xeb   : > { %v447_v48 = vadd.f32 %v1164_v40, %v446_v47  ;;  %v506_v51 = vmax.f32 %v444_v44, 0.0 }
  0xec   : > { %v509_v50 = vmax.f32 %v455_v46, 0.0 }
  0xed   : > { %v507_v52 = vmax.f32 %v447_v48, 0.0 }
  0xee   : > { %v523_v53 = vpack.c.bf16 %v509_v50, %v508_v49 }
  0xef   : > { %v1272_v54 = vpop.f32.mrb[4].mxu0  ;;  %v522_v55 = vpack.c.bf16 %v507_v52, %v506_v51 }
  0xf0   : > { %v468_v56 = vadd.f32 %v1272_v54, %v1164_v40  ;;  %v459_v57 = vpop.f32.mrb[5].mxu0 }
  0xf1   : > { %v460_v58 = vadd.f32 %v1164_v40, %v459_v57  ;;  %v1273_v59 = vpop.f32.mrb[6].mxu0  ;;  %1298 = vmatprep.mubr.bf16.mxu1 %v522_v55 }
  0xf2   : > { %v471_v60 = vadd.f32 %v1273_v59, %v1164_v40  ;;  %v462_v61 = vpop.f32.mrb[7].mxu0  ;;  %1299 = vmatmul.mubr.bf16.vlgmr.msra.gmra.mrb[0].mxu1 %v523_v53  ;;  %v512_v63 = vmax.f32 %v468_v56, 0.0 }
  0xf3   : > { %v463_v62 = vadd.f32 %v1164_v40, %v462_v61  ;;  %v510_v1 = vmax.f32 %v460_v58, 0.0  ;;  %1386 = vmatpush3.bf16.msra.mxu1 %v1420_v35 }
  0xf4   : > { %v513_v0 = vmax.f32 %v471_v60, 0.0  ;;  %1379 = vmatprep.subr.bf16.mxu1 %v1421_v36 }
  0xf5   : > { %v511_v2 = vmax.f32 %v463_v62, 0.0 }
  0xf6   : > { %v525_v3 = vpack.c.bf16 %v513_v0, %v512_v63 }
  0xf7   : > { %v524_v4 = vpack.c.bf16 %v511_v2, %v510_v1  ;;  %v1276_v5 = vpop.f32.mrb[8].mxu0  ;;  %1387 = vmatpush3.bf16.msra.mxu1 %v1421_v36 }
  0xf8   : > { %v484_v6 = vadd.f32 %v1276_v5, %v1164_v40  ;;  %v475_v7 = vpop.f32.mrb[9].mxu0  ;;  %1380 = vmatprep.subr.bf16.mxu1 %v1422_v37 }
  0xf9   : > { %v476_v8 = vadd.f32 %v1164_v40, %v475_v7  ;;  %v1277_v9 = vpop.f32.mrb[10].mxu0  ;;  %1302 = vmatprep.mubr.bf16.mxu1 %v524_v4 }
  0xfa   : > { %v487_v10 = vadd.f32 %v1277_v9, %v1164_v40  ;;  %v478_v11 = vpop.f32.mrb[11].mxu0  ;;  %1303 = vmatmul.mubr.bf16.gmra.mrb[4].mxu1 %v525_v3  ;;  %v516_v13 = vmax.f32 %v484_v6, 0.0 }
  0xfb   : > { %v479_v12 = vadd.f32 %v1164_v40, %v478_v11  ;;  %v514_v15 = vmax.f32 %v476_v8, 0.0  ;;  %1388 = vmatpush3.bf16.msra.mxu1 %v1422_v37 }
  0xfc   : > { %v517_v14 = vmax.f32 %v487_v10, 0.0  ;;  %1381 = vmatprep.subr.bf16.mxu1 %v1597_v38 }
  0xfd   : > { %v515_v16 = vmax.f32 %v479_v12, 0.0 }
  0xfe   : > { %v527_v17 = vpack.c.bf16 %v517_v14, %v516_v13 }
  0xff   : > { %v526_v18 = vpack.c.bf16 %v515_v16, %v514_v15  ;;  %v1280_v19 = vpop.f32.mrb[12].mxu0  ;;  %1389 = vmatpush3.bf16.msra.mxu1 %v1597_v38 }
 0x100   : > { %v500_v20 = vadd.f32 %v1280_v19, %v1164_v40  ;;  %v491_v21 = vpop.f32.mrb[13].mxu0  ;;  %1382 = vmatprep.subr.bf16.mxu1 %v1603_v39 }
 0x101   : > { %v492_v22 = vadd.f32 %v1164_v40, %v491_v21  ;;  %v1281_v23 = vpop.f32.mrb[14].mxu0  ;;  %1306 = vmatprep.mubr.bf16.mxu1 %v526_v18 }
 0x102   : > { %v503_v24 = vadd.f32 %v1281_v23, %v1164_v40  ;;  %v494_v25 = vpop.f32.mrb[15].mxu0  ;;  %1307 = vmatmul.mubr.bf16.gmra.mrb[8].mxu1 %v527_v17  ;;  %v520_v27 = vmax.f32 %v500_v20, 0.0 }
 0x103   : > { %v495_v26 = vadd.f32 %v1164_v40, %v494_v25  ;;  %v518_v29 = vmax.f32 %v492_v22, 0.0  ;;  %v1610_v40 = vld [vmem:[%s1703_s7 + $0x28] sm:$0xff]   ;;  %1390 = vmatpush3.bf16.msra.mxu1 %v1603_v39 }
 0x104   : > { %v521_v28 = vmax.f32 %v503_v24, 0.0  ;;  %1383 = vmatprep.subr.bf16.mxu1 %v1610_v40 }
 0x105   : > { %v519_v30 = vmax.f32 %v495_v26, 0.0 }
 0x106   : > { %v529_v31 = vpack.c.bf16 %v521_v28, %v520_v27 }
 0x107   : > { %v528_v32 = vpack.c.bf16 %v519_v30, %v518_v29  ;;  %1391 = vmatpush3.bf16.msra.mxu1 %v1610_v40 }
 0x108   : > { %1384 = vmatprep.subr.bf16.mxu1 %v1426_v34 }
 0x109   : > { %1310 = vmatprep.mubr.bf16.mxu1 %v528_v32 }
 0x10a   : > { %1311 = vmatmul.mubr.bf16.gmra.mrb[12].mxu1 %v529_v31 }
 0x10b   : > { %1392 = vmatpush3.bf16.msra.mxu1 %v1426_v34 }
 0x1c5   : > { %v1300_v42 = vpop.f32.mrb[0].mxu1 }
 0x1c6   : > { %v644_v43 = vadd.f32 %v1300_v42, %v1618_v41  ;;  %v635_v44 = vpop.f32.mrb[1].mxu1 }
 0x1c7   : > { %v636_v45 = vadd.f32 %v1618_v41, %v635_v44  ;;  %v1301_v46 = vpop.f32.mrb[2].mxu1 }
 0x1c8   : > { %v647_v47 = vadd.f32 %v1301_v46, %v1618_v41  ;;  %v638_v48 = vpop.f32.mrb[3].mxu1  ;;  %v700_v50 = vmax.f32 %v644_v43, 0.0 }
 0x1c9   : > { %v639_v49 = vadd.f32 %v1618_v41, %v638_v48  ;;  %v698_v52 = vmax.f32 %v636_v45, 0.0 }
 0x1ca   : > { %v701_v51 = vmax.f32 %v647_v47, 0.0 }
 0x1cb   : > { %v699_v53 = vmax.f32 %v639_v49, 0.0 }
 0x1cc   : > { %v715_v54 = vpack.c.bf16 %v701_v51, %v700_v50 }
 0x1cd   : > { %v714_v55 = vpack.c.bf16 %v699_v53, %v698_v52  ;;  %v1304_v56 = vpop.f32.mrb[4].mxu1 }
 0x1ce   : > { %v660_v57 = vadd.f32 %v1304_v56, %v1618_v41  ;;  %v651_v58 = vpop.f32.mrb[5].mxu1 }
 0x1cf   : > { %v652_v59 = vadd.f32 %v1618_v41, %v651_v58  ;;  %v1305_v60 = vpop.f32.mrb[6].mxu1  ;;  %1330 = vmatprep.mubr.bf16.mxu0 %v714_v55 }
 0x1d0   : > { %v663_v61 = vadd.f32 %v1305_v60, %v1618_v41  ;;  %v654_v62 = vpop.f32.mrb[7].mxu1  ;;  %1331 = vmatmul.mubr.bf16.vlgmr.msra.gmra.mrb[16].mxu0 %v715_v54  ;;  %v704_v0 = vmax.f32 %v660_v57, 0.0 }
 0x1d1   : > { %v655_v63 = vadd.f32 %v1618_v41, %v654_v62  ;;  %1347 = vmatpush3.bf16.msra.mxu0 %v1420_v35  ;;  %v702_v2 = vmax.f32 %v652_v59, 0.0  ;;  %v1427_v35 = vld [vmem:[%s1703_s7 + $0x38] sm:$0xff]  }
 0x1d2   : > { %v705_v1 = vmax.f32 %v663_v61, 0.0  ;;  %1348 = vmatprep.subr.bf16.mxu0 %v1421_v36  ;;  %1385 = vmatprep.subr.bf16.mxu1 %v1427_v35 }
 0x1d3   : > { %v703_v3 = vmax.f32 %v655_v63, 0.0  ;;  %1393 = vmatpush3.bf16.msra.mxu1 %v1427_v35 }
 0x1d4   : > { %v717_v4 = vpack.c.bf16 %v705_v1, %v704_v0 }
 0x1d5   : > { %v716_v5 = vpack.c.bf16 %v703_v3, %v702_v2  ;;  %v1308_v6 = vpop.f32.mrb[8].mxu1  ;;  %1349 = vmatpush3.bf16.msra.mxu0 %v1421_v36  ;;  %v1184_v36 = vld [vmem:[%s1702_s6] ss:$0 sm:$0xff] }
 0x1d6   : > { %v676_v7 = vadd.f32 %v1308_v6, %v1618_v41  ;;  %v667_v8 = vpop.f32.mrb[9].mxu1  ;;  %1350 = vmatprep.subr.bf16.mxu0 %v1422_v37 }
 0x1d7   : > { %v668_v9 = vadd.f32 %v1618_v41, %v667_v8  ;;  %v1309_v10 = vpop.f32.mrb[10].mxu1  ;;  %1334 = vmatprep.mubr.bf16.mxu0 %v716_v5 }
 0x1d8   : > { %v679_v11 = vadd.f32 %v1309_v10, %v1618_v41  ;;  %v670_v12 = vpop.f32.mrb[11].mxu1  ;;  %1335 = vmatmul.mubr.bf16.gmra.mrb[20].mxu0 %v717_v4  ;;  %v708_v14 = vmax.f32 %v676_v7, 0.0 }
 0x1d9   : > { %v671_v13 = vadd.f32 %v1618_v41, %v670_v12  ;;  %1351 = vmatpush3.bf16.msra.mxu0 %v1422_v37  ;;  %v706_v16 = vmax.f32 %v668_v9, 0.0 }
 0x1da   : > { %v709_v15 = vmax.f32 %v679_v11, 0.0  ;;  %1352 = vmatprep.subr.bf16.mxu0 %v1597_v38 }
 0x1db   : > { %v707_v17 = vmax.f32 %v671_v13, 0.0 }
 0x1dc   : > { %v719_v18 = vpack.c.bf16 %v709_v15, %v708_v14 }
 0x1dd   : > { %v718_v19 = vpack.c.bf16 %v707_v17, %v706_v16  ;;  %v1312_v20 = vpop.f32.mrb[12].mxu1  ;;  %1353 = vmatpush3.bf16.msra.mxu0 %v1597_v38 }
 0x1de   : > { %v692_v21 = vadd.f32 %v1312_v20, %v1618_v41  ;;  %v683_v22 = vpop.f32.mrb[13].mxu1  ;;  %1354 = vmatprep.subr.bf16.mxu0 %v1603_v39 }
 0x1df   : > { %v684_v23 = vadd.f32 %v1618_v41, %v683_v22  ;;  %v1313_v24 = vpop.f32.mrb[14].mxu1  ;;  %1338 = vmatprep.mubr.bf16.mxu0 %v718_v19 }
 0x1e0   : > { %v695_v25 = vadd.f32 %v1313_v24, %v1618_v41  ;;  %v686_v26 = vpop.f32.mrb[15].mxu1  ;;  %1339 = vmatmul.mubr.bf16.gmra.mrb[24].mxu0 %v719_v18  ;;  %v712_v28 = vmax.f32 %v692_v21, 0.0 }
 0x1e1   : > { %v687_v27 = vadd.f32 %v1618_v41, %v686_v26  ;;  %1355 = vmatpush3.bf16.msra.mxu0 %v1603_v39  ;;  %v710_v30 = vmax.f32 %v684_v23, 0.0 }
 0x1e2   : > { %v713_v29 = vmax.f32 %v695_v25, 0.0  ;;  %1356 = vmatprep.subr.bf16.mxu0 %v1610_v40 }
 0x1e3   : > { %v711_v31 = vmax.f32 %v687_v27, 0.0 }
 0x1e4   : > { %v721_v32 = vpack.c.bf16 %v713_v29, %v712_v28  ;;  %v1193_v29 = vld [vmem:[%s1704_s8] ss:$0 sm:$0xff] }
 0x1e5   : > { %v720_v33 = vpack.c.bf16 %v711_v31, %v710_v30  ;;  %1357 = vmatpush3.bf16.msra.mxu0 %v1610_v40 }
 0x1e6   : > { %1358 = vmatprep.subr.bf16.mxu0 %v1426_v34 }
 0x1e7   : > { %1342 = vmatprep.mubr.bf16.mxu0 %v720_v33 }
 0x1e8   : > { %1343 = vmatmul.mubr.bf16.gmra.mrb[28].mxu0 %v721_v32 }
 0x1e9   : > { %1359 = vmatpush3.bf16.msra.mxu0 %v1426_v34 }
 0x1ea   : > { %1360 = vmatprep.subr.bf16.mxu0 %v1427_v35 }
 0x1ed   : > { %1361 = vmatpush3.bf16.msra.mxu0 %v1427_v35 }
 0x2a3   : > { %v1332_v37 = vpop.f32.mrb[16].mxu0 }
 0x2a4   : > { %v836_v38 = vadd.f32 %v1332_v37, %v1184_v36  ;;  %v827_v39 = vpop.f32.mrb[17].mxu0 }
 0x2a5   : > { %v828_v40 = vadd.f32 %v1184_v36, %v827_v39  ;;  %v1333_v41 = vpop.f32.mrb[18].mxu0 }
 0x2a6   : > { %v839_v42 = vadd.f32 %v1333_v41, %v1184_v36  ;;  %v830_v43 = vpop.f32.mrb[19].mxu0  ;;  %v892_v45 = vmax.f32 %v836_v38, 0.0 }
 0x2a7   : > { %v831_v44 = vadd.f32 %v1184_v36, %v830_v43  ;;  %v890_v47 = vmax.f32 %v828_v40, 0.0 }
 0x2a8   : > { %v893_v46 = vmax.f32 %v839_v42, 0.0 }
 0x2a9   : > { %v891_v48 = vmax.f32 %v831_v44, 0.0 }
 0x2aa   : > { %v907_v49 = vpack.c.bf16 %v893_v46, %v892_v45 }
 0x2ab   : > { %v906_v50 = vpack.c.bf16 %v891_v48, %v890_v47  ;;  %v1336_v51 = vpop.f32.mrb[20].mxu0 }
 0x2ac   : > { %v852_v52 = vadd.f32 %v1336_v51, %v1184_v36  ;;  %v843_v53 = vpop.f32.mrb[21].mxu0 }
 0x2ad   : > { %v844_v54 = vadd.f32 %v1184_v36, %v843_v53  ;;  %v1337_v55 = vpop.f32.mrb[22].mxu0  ;;  %1362 = vmatprep.mubr.bf16.mxu0 %v906_v50 }
 0x2ae   : > { %v855_v56 = vadd.f32 %v1337_v55, %v1184_v36  ;;  %v846_v57 = vpop.f32.mrb[23].mxu0  ;;  %1363 = vmatmul.mubr.bf16.vlgmr.msra.gmra.mrb[32].mxu0 %v907_v49  ;;  %v896_v59 = vmax.f32 %v852_v52, 0.0 }
 0x2af   : > { %v847_v58 = vadd.f32 %v1184_v36, %v846_v57  ;;  %v894_v61 = vmax.f32 %v844_v54, 0.0 }
 0x2b0   : > { %v897_v60 = vmax.f32 %v855_v56, 0.0 }
 0x2b1   : > { %v895_v62 = vmax.f32 %v847_v58, 0.0 }
 0x2b2   : > { %v909_v63 = vpack.c.bf16 %v897_v60, %v896_v59 }
 0x2b3   : > { %v908_v0 = vpack.c.bf16 %v895_v62, %v894_v61  ;;  %v1340_v1 = vpop.f32.mrb[24].mxu0 }
 0x2b4   : > { %v868_v2 = vadd.f32 %v1340_v1, %v1184_v36  ;;  %v859_v3 = vpop.f32.mrb[25].mxu0 }
 0x2b5   : > { %v860_v4 = vadd.f32 %v1184_v36, %v859_v3  ;;  %v1341_v5 = vpop.f32.mrb[26].mxu0  ;;  %1366 = vmatprep.mubr.bf16.mxu1 %v908_v0 }
 0x2b6   : > { %v871_v6 = vadd.f32 %v1341_v5, %v1184_v36  ;;  %v862_v7 = vpop.f32.mrb[27].mxu0  ;;  %1367 = vmatmul.mubr.bf16.vlgmr.msra.gmra.mrb[16].mxu1 %v909_v63  ;;  %v900_v9 = vmax.f32 %v868_v2, 0.0 }
 0x2b7   : > { %v863_v8 = vadd.f32 %v1184_v36, %v862_v7  ;;  %v898_v11 = vmax.f32 %v860_v4, 0.0 }
 0x2b8   : > { %v901_v10 = vmax.f32 %v871_v6, 0.0 }
 0x2b9   : > { %v899_v12 = vmax.f32 %v863_v8, 0.0 }
 0x2ba   : > { %v911_v13 = vpack.c.bf16 %v901_v10, %v900_v9 }
 0x2bb   : > { %v910_v14 = vpack.c.bf16 %v899_v12, %v898_v11  ;;  %v1344_v15 = vpop.f32.mrb[28].mxu0 }
 0x2bc   : > { %v884_v16 = vadd.f32 %v1344_v15, %v1184_v36  ;;  %v875_v17 = vpop.f32.mrb[29].mxu0 }
 0x2bd   : > { %v876_v18 = vadd.f32 %v1184_v36, %v875_v17  ;;  %v1345_v19 = vpop.f32.mrb[30].mxu0  ;;  %1370 = vmatprep.mubr.bf16.mxu1 %v910_v14 }
 0x2be   : > { %v887_v20 = vadd.f32 %v1345_v19, %v1184_v36  ;;  %v878_v21 = vpop.f32.mrb[31].mxu0  ;;  %1371 = vmatmul.mubr.bf16.gmra.mrb[20].mxu1 %v911_v13  ;;  %v904_v23 = vmax.f32 %v884_v16, 0.0 }
 0x2bf   : > { %v879_v22 = vadd.f32 %v1184_v36, %v878_v21  ;;  %v902_v25 = vmax.f32 %v876_v18, 0.0 }
 0x2c0   : > { %v905_v24 = vmax.f32 %v887_v20, 0.0 }
 0x2c1   : > { %v903_v26 = vmax.f32 %v879_v22, 0.0 }
 0x2c2   : > { %v913_v27 = vpack.c.bf16 %v905_v24, %v904_v23 }
 0x2c3   : > { %v912_v28 = vpack.c.bf16 %v903_v26, %v902_v25 }
 0x2c5   : > { %1374 = vmatprep.mubr.bf16.mxu1 %v912_v28 }
 0x2c6   : > { %1375 = vmatmul.mubr.bf16.gmra.mrb[24].mxu1 %v913_v27 }
 0x381   : > { %v1364_v30 = vpop.f32.mrb[32].mxu0 }
 0x382   : > { %v1028_v31 = vadd.f32 %v1364_v30, %v1193_v29  ;;  %v1019_v32 = vpop.f32.mrb[33].mxu0 }
 0x383   : > { %v1020_v33 = vadd.f32 %v1193_v29, %v1019_v32  ;;  %v1365_v34 = vpop.f32.mrb[34].mxu0 }
 0x384   : > { %1085 = vst.msk [vmem:[%s1659_s24 + $0x10] sm:$0xff] %vm1082_vm1, %v1028_v31  ;;  %v1031_v35 = vadd.f32 %v1365_v34, %v1193_v29  ;;  %v1022_v36 = vpop.f32.mrb[35].mxu0 }
 0x385   : > { %1083 = vst.msk [vmem:[%s1659_s24] sm:$0xff] %vm1082_vm1, %v1020_v33  ;;  %v1023_v37 = vadd.f32 %v1193_v29, %v1022_v36 }
 0x386   : > { %1086 = vst.msk [vmem:[%s1659_s24 + $0x18] sm:$0xff] %vm1082_vm1, %v1031_v35 }
 0x387   : > { %1084 = vst.msk [vmem:[%s1659_s24 + $0x8] sm:$0xff] %vm1082_vm1, %v1023_v37 }
 0x389   : > { %v1368_v38 = vpop.f32.mrb[16].mxu1 }
 0x38a   : > { %v1044_v39 = vadd.f32 %v1368_v38, %v1193_v29  ;;  %v1035_v40 = vpop.f32.mrb[17].mxu1 }
 0x38b   : > { %v1036_v41 = vadd.f32 %v1193_v29, %v1035_v40  ;;  %v1369_v42 = vpop.f32.mrb[18].mxu1 }
 0x38c   : > { %1089 = vst.msk [vmem:[%s1659_s24 + $0x30] sm:$0xff] %vm1082_vm1, %v1044_v39  ;;  %v1047_v43 = vadd.f32 %v1369_v42, %v1193_v29  ;;  %v1038_v44 = vpop.f32.mrb[19].mxu1 }
 0x38d   : > { %1087 = vst.msk [vmem:[%s1659_s24 + $0x20] sm:$0xff] %vm1082_vm1, %v1036_v41  ;;  %v1039_v45 = vadd.f32 %v1193_v29, %v1038_v44 }
 0x38e   : > { %1090 = vst.msk [vmem:[%s1659_s24 + $0x38] sm:$0xff] %vm1082_vm1, %v1047_v43 }
 0x38f   : > { %1088 = vst.msk [vmem:[%s1659_s24 + $0x28] sm:$0xff] %vm1082_vm1, %v1039_v45 }
 0x391   : > { %v1372_v46 = vpop.f32.mrb[20].mxu1 }
 0x392   : > { %v1060_v47 = vadd.f32 %v1372_v46, %v1193_v29  ;;  %v1051_v48 = vpop.f32.mrb[21].mxu1 }
 0x393   : > { %v1052_v49 = vadd.f32 %v1193_v29, %v1051_v48  ;;  %v1373_v50 = vpop.f32.mrb[22].mxu1 }
 0x394   : > { %1093 = vst.msk [vmem:[%s1659_s24 + $0x50] sm:$0xff] %vm1082_vm1, %v1060_v47  ;;  %v1063_v51 = vadd.f32 %v1373_v50, %v1193_v29  ;;  %v1054_v52 = vpop.f32.mrb[23].mxu1 }
 0x395   : > { %1091 = vst.msk [vmem:[%s1659_s24 + $0x40] sm:$0xff] %vm1082_vm1, %v1052_v49  ;;  %v1055_v53 = vadd.f32 %v1193_v29, %v1054_v52 }
 0x396   : > { %1094 = vst.msk [vmem:[%s1659_s24 + $0x58] sm:$0xff] %vm1082_vm1, %v1063_v51 }
 0x397   : > { %1092 = vst.msk [vmem:[%s1659_s24 + $0x48] sm:$0xff] %vm1082_vm1, %v1055_v53 }
 0x399   : > { %v1376_v54 = vpop.f32.mrb[24].mxu1 }
 0x39a   : > { %v1076_v55 = vadd.f32 %v1376_v54, %v1193_v29  ;;  %v1067_v56 = vpop.f32.mrb[25].mxu1 }
 0x39b   : > { %v1068_v57 = vadd.f32 %v1193_v29, %v1067_v56  ;;  %v1377_v58 = vpop.f32.mrb[26].mxu1 }
 0x39c   : > { %1097 = vst.msk [vmem:[%s1659_s24 + $0x70] sm:$0xff] %vm1082_vm1, %v1076_v55  ;;  %v1079_v59 = vadd.f32 %v1377_v58, %v1193_v29  ;;  %v1070_v60 = vpop.f32.mrb[27].mxu1 }
 0x39d   : > { %1095 = vst.msk [vmem:[%s1659_s24 + $0x60] sm:$0xff] %vm1082_vm1, %v1068_v57  ;;  %v1071_v61 = vadd.f32 %v1193_v29, %v1070_v60 }
 0x39e   : > { %1098 = vst.msk [vmem:[%s1659_s24 + $0x78] sm:$0xff] %vm1082_vm1, %v1079_v59 }
 0x39f   : > { %1096 = vst.msk [vmem:[%s1659_s24 + $0x68] sm:$0xff] %vm1082_vm1, %v1071_v61 }
 0x3a0 PF: > { %s19_s30 = sadd.s32 1, %s1434_s30  }
 0x3a1   : > { %p16_p4 = scmp.ge.s32.totalorder %s19_s30, 4  }
 0x3a3   :  { %18 = sbr.rel (!%p16_p4) target bundleno = 1 (0x1), region = 86 }

</bundles_post_ra>
